<compile_context>
chip_gen: v5e
topology: v5e:2x2
jax: 0.10.0
libtpu: 0.0.40
codegen_flags: <defaults>
</compile_context>

<pallas_src>
import functools

import jax
import jax.numpy as jnp
from jax import lax
from jax.experimental import pallas as pl
from jax.experimental.pallas import tpu as pltpu


def _round_up(x: int, m: int) -> int:
    return ((x + m - 1) // m) * m


def _vmem_capacity_bytes() -> int:
    """Physical VMEM capacity (64 MiB v7x, 128 MiB v5e/v6e); safe fallback."""
    try:
        info = pltpu.get_tpu_info()
        cap = int(getattr(info, "vmem_capacity_bytes", 0) or 0)
        if cap > 0:
            return cap
    except Exception:
        pass
    return 64 * 1024 * 1024


# --------------------------------------------------------------------------
# Kernel 1: logits tile -> HBM, online (running max / sum-exp) LSE per row.
# --------------------------------------------------------------------------
def _logits_lse_kernel(x_ref, w_ref, b_ref, logits_ref, lse_ref, m_ref, l_ref,
                       *, vocab, needs_mask):
    """One (row_tile, vocab_tile) step.

    x_ref:      (tm, d_model)   input rows (native dtype -> MXU)
    w_ref:      (tv, d_model)   weight tile, native nn.Linear layout
    b_ref:      (1, tv)         bias tile
    logits_ref: (tm, tv)        raw logits (out_dtype), written every step
    lse_ref:    (tm, 1) f32     logsumexp, written only at the last vocab tile
    m_ref/l_ref:(tm, 1) f32     running max / running sum-exp (VMEM scratch)
    """
    j = pl.program_id(1)
    nv = pl.num_programs(1)

    # MXU matmul contracting the last dim of both operands (x @ w.T), f32 acc.
    logits = lax.dot_general(
        x_ref[...], w_ref[...],
        dimension_numbers=(((1,), (1,)), ((), ())),
        preferred_element_type=jnp.float32)
    logits = logits + b_ref[...].astype(jnp.float32)          # (tm, tv) f32

    if needs_mask:
        # Ragged vocab edge: out-of-range columns (garbage weight/bias reads)
        # are forced to a huge negative so they never touch the normalizer.
        tv = logits.shape[-1]
        col = j * tv + lax.broadcasted_iota(jnp.int32, logits.shape, 1)
        logits = jnp.where(col < vocab, logits, -1e30)

    # Raw logits straight to HBM; normalized by the elementwise fixup kernel.
    logits_ref[...] = logits.astype(logits_ref.dtype)

    @pl.when(j == 0)
    def _():
        m_ref[...] = jnp.full_like(m_ref, -1e30)
        l_ref[...] = jnp.zeros_like(l_ref)

    m_prev = m_ref[...]
    m_new = jnp.maximum(m_prev, jnp.max(logits, axis=-1, keepdims=True))
    l_ref[...] = (l_ref[...] * jnp.exp(m_prev - m_new)
                  + jnp.sum(jnp.exp(logits - m_new), axis=-1, keepdims=True))
    m_ref[...] = m_new

    @pl.when(j == nv - 1)
    def _():
        lse_ref[...] = m_ref[...] + jnp.log(l_ref[...])


# --------------------------------------------------------------------------
# Kernel 2: elementwise fixup, in place (logits HBM buffer aliased to output).
# --------------------------------------------------------------------------
def _fixup_kernel(logits_ref, lse_ref, out_ref):
    out_ref[...] = (logits_ref[...].astype(jnp.float32)
                    - lse_ref[...]).astype(out_ref.dtype)


@functools.partial(jax.jit,
                   static_argnames=("tm", "tv", "out_dtype", "vmem_limit"))
def _projection_2d(x2d, weight, b2d, *, tm, tv, out_dtype, vmem_limit):
    rows, d_model = x2d.shape
    vocab = weight.shape[0]
    nr = pl.cdiv(rows, tm)
    nv = pl.cdiv(vocab, tv)
    needs_mask = (vocab % tv) != 0

    xb = x2d.dtype.itemsize
    wb = weight.dtype.itemsize
    ob = jnp.dtype(out_dtype).itemsize

    cost1 = pl.CostEstimate(
        flops=2 * nr * tm * nv * tv * d_model,
        transcendentals=nr * tm * nv * tv,
        bytes_accessed=(rows * d_model * xb
                        + nr * (vocab * d_model * wb + vocab * 4)  # weight streamed per row tile
                        + rows * vocab * ob + rows * 4))

    logits, lse = pl.pallas_call(
        functools.partial(_logits_lse_kernel, vocab=vocab, needs_mask=needs_mask),
        out_shape=(jax.ShapeDtypeStruct((rows, vocab), out_dtype),
                   jax.ShapeDtypeStruct((rows, 1), jnp.float32)),
        grid_spec=pltpu.PrefetchScalarGridSpec(
            num_scalar_prefetch=0,
            grid=(nr, nv),
            in_specs=[
                # x tile: constant across the vocab axis -> fetched once per row tile.
                pl.BlockSpec((tm, d_model), lambda i, j: (i, 0)),
                # weight tile in native (vocab, d_model) layout: walks the vocab axis.
                pl.BlockSpec((tv, d_model), lambda i, j: (j, 0)),
                # bias tile.
                pl.BlockSpec((1, tv), lambda i, j: (0, j)),
            ],
            out_specs=(
                pl.BlockSpec((tm, tv), lambda i, j: (i, j)),   # raw logits
                pl.BlockSpec((tm, 1), lambda i, j: (i, 0)),    # lse (written at last j)
            ),
            scratch_shapes=[pltpu.VMEM((tm, 1), jnp.float32),   # running max
                            pltpu.VMEM((tm, 1), jnp.float32)],  # running sum-exp
        ),
        compiler_params=pltpu.CompilerParams(
            dimension_semantics=("parallel", "arbitrary"),
            vmem_limit_bytes=vmem_limit),
        cost_estimate=cost1,
    )(x2d, weight, b2d)

    cost2 = pl.CostEstimate(
        flops=rows * vocab,
        transcendentals=0,
        bytes_accessed=2 * rows * vocab * ob + rows * 4)

    out = pl.pallas_call(
        _fixup_kernel,
        out_shape=jax.ShapeDtypeStruct((rows, vocab), out_dtype),
        grid_spec=pltpu.PrefetchScalarGridSpec(
            num_scalar_prefetch=0,
            grid=(nr, nv),
            in_specs=[pl.BlockSpec((tm, tv), lambda i, j: (i, j)),
                      pl.BlockSpec((tm, 1), lambda i, j: (i, 0))],
            out_specs=pl.BlockSpec((tm, tv), lambda i, j: (i, j)),
        ),
        input_output_aliases={0: 0},   # normalize the logits buffer in place
        compiler_params=pltpu.CompilerParams(
            dimension_semantics=("parallel", "parallel"),
            vmem_limit_bytes=vmem_limit),
        cost_estimate=cost2,
    )(logits, lse)
    return out


def projection_layer(x, weight, bias, *, row_tile=512, vocab_tile=2048,
                     out_dtype=None):
    """log_softmax(x @ weight.T + bias, axis=-1).

    Args:
      x:      (batch, seq, d_model)       f32 or bf16
      weight: (vocab, d_model)            PyTorch nn.Linear weight layout (no transpose needed)
      bias:   (vocab,)
    Returns:
      (batch, seq, vocab) log-probabilities in `out_dtype` (default: x.dtype).
    """
    batch, seq, d_model = x.shape
    vocab = weight.shape[0]
    assert weight.shape[1] == d_model and bias.shape == (vocab,)
    out_dtype = jnp.dtype(x.dtype if out_dtype is None else out_dtype)

    rows = batch * seq

    # ---- tile selection --------------------------------------------------
    # 16-row alignment for packed 16-bit activations/outputs, else 8.
    row_align = 16 if (jnp.dtype(x.dtype).itemsize < 4 or out_dtype.itemsize < 4) else 8
    tm = _round_up(min(row_tile, _round_up(rows, row_align)), row_align)
    # Keep >= 2 row tiles when the batch is large enough (lets the 'parallel'
    # row axis split across both v7x TensorCores without shrinking tiles much).
    if rows >= 512 and pl.cdiv(rows, tm) == 1:
        tm = _round_up(pl.cdiv(rows, 2), row_align)

    if vocab >= 128:
        tv = min(vocab_tile, (vocab // 128) * 128)   # lane-dense, <= vocab when possible
    else:
        tv = 128
    tv = max(128, (tv // 128) * 128)

    # ---- VMEM budget (generation-aware) -----------------------------------
    cap = _vmem_capacity_bytes()                     # 64 MiB v7x, 128 MiB v5e/v6e
    vmem_limit = int(min(cap * 0.85, 112 * 1024 * 1024))
    budget = int(cap * 0.70)                         # leave compiler scratch headroom

    xb = jnp.dtype(x.dtype).itemsize
    wb = jnp.dtype(weight.dtype).itemsize
    ob = out_dtype.itemsize

    def _kernel1_vmem(tm_, tv_):
        # double-buffered inputs/outputs + f32 scratch
        return (2 * (tm_ * d_model * xb + tv_ * d_model * wb + tv_ * 4
                     + tm_ * tv_ * ob + tm_ * 4)
                + 2 * tm_ * 4)

    while _kernel1_vmem(tm, tv) > budget and tv > 256:
        tv = max(256, ((tv // 2) // 128) * 128)
    while _kernel1_vmem(tm, tv) > budget and tm > 2 * row_align:
        tm = max(row_align, _round_up(tm // 2, row_align))

    out2d = _projection_2d(
        x.reshape(rows, d_model), weight, bias.reshape(1, vocab),
        tm=tm, tv=tv, out_dtype=out_dtype, vmem_limit=vmem_limit)
    return out2d.reshape(batch, seq, vocab)


if __name__ == "__main__":
    # Small shapes consistent with the module: (batch, seq, d_model) -> vocab.
    batch, seq, d_model, vocab = 2, 8, 32, 512

    key = jax.random.PRNGKey(0)
    kx, kw, kb = jax.random.split(key, 3)

    bound = 1.0 / (d_model ** 0.5)
    weight = jax.random.uniform(kw, (vocab, d_model), jnp.float32, -bound, bound)
    bias = jax.random.uniform(kb, (vocab,), jnp.float32, -bound, bound)
    x = jax.random.normal(kx, (batch, seq, d_model), jnp.float32)

    # 1) f32 path, small vocab tile so the multi-tile online LSE is exercised.
    out = jax.block_until_ready(projection_layer(x, weight, bias, vocab_tile=256))
    ref = jax.nn.log_softmax(x @ weight.T + bias, axis=-1)
    assert out.shape == (batch, seq, vocab)
    assert jnp.allclose(out, ref, atol=1e-5, rtol=1e-5), "f32 mismatch vs reference"

    # 2) vocab not a multiple of 128 -> exercises ragged-edge masking (no padding copies).
    vocab2 = 200
    w2 = jax.random.uniform(kw, (vocab2, d_model), jnp.float32, -bound, bound)
    b2 = jax.random.uniform(kb, (vocab2,), jnp.float32, -bound, bound)
    out2 = jax.block_until_ready(projection_layer(x, w2, b2))
    ref2 = jax.nn.log_softmax(x @ w2.T + b2, axis=-1)
    assert out2.shape == (batch, seq, vocab2)
    assert jnp.allclose(out2, ref2, atol=1e-5, rtol=1e-5), "ragged-vocab mismatch"

    # 3) bf16 path: bf16 feeds the MXU directly; accumulation/softmax stay f32.
    xb_ = x.astype(jnp.bfloat16)
    wb_ = weight.astype(jnp.bfloat16)
    bb_ = bias.astype(jnp.bfloat16)
    out_b = jax.block_until_ready(projection_layer(xb_, wb_, bb_, vocab_tile=256))
    ref_b = jax.nn.log_softmax(
        xb_.astype(jnp.float32) @ wb_.astype(jnp.float32).T + bb_.astype(jnp.float32),
        axis=-1)
    assert out_b.dtype == jnp.bfloat16
    assert jnp.allclose(out_b.astype(jnp.float32), ref_b, atol=1e-1, rtol=1e-2), \
        "bf16 mismatch vs reference"

    print("KERNEL_OK")
</pallas_src>

<mosaic_0001>
module attributes {stable_mosaic.version = 11 : i64} {
  func.func @_fixup_kernel(%arg0: i32, %arg1: i32, %arg2: memref<16x256xf32, #tpu.memory_space<vmem>>, %arg3: memref<16x1xf32, #tpu.memory_space<vmem>>, %arg4: memref<16x256xf32, #tpu.memory_space<vmem>>) attributes {dimension_semantics = [#tpu.dimension_semantics<parallel>, #tpu.dimension_semantics<parallel>], iteration_bounds = array<i64: 1, 2>, scalar_prefetch = 0 : i64, scratch_operands = 0 : i64, tpu.core_type = #tpu.core_type<tc>, window_params = [{transform_indices = @transform_0, window_bounds = array<i64: 16, 256>}, {transform_indices = @transform_1, window_bounds = array<i64: 16, 1>}, {transform_indices = @transform_2, window_bounds = array<i64: 16, 256>}]} {
    %c0 = arith.constant 0 : index
    %c0_0 = arith.constant 0 : index
    %0 = vector.load %arg2[%c0, %c0_0] : memref<16x256xf32, #tpu.memory_space<vmem>>, vector<16x256xf32>
    %c0_1 = arith.constant 0 : index
    %c0_2 = arith.constant 0 : index
    %1 = vector.load %arg3[%c0_1, %c0_2] : memref<16x1xf32, #tpu.memory_space<vmem>>, vector<16x1xf32>
    %2 = vector.broadcast %1 : vector<16x1xf32> to vector<16x256xf32>
    %3 = arith.subf %0, %2 : vector<16x256xf32>
    %c0_3 = arith.constant 0 : index
    %c0_4 = arith.constant 0 : index
    %4 = vector.load %arg4[%c0_3, %c0_4] : memref<16x256xf32, #tpu.memory_space<vmem>>, vector<16x256xf32>
    tpu.vector_store %arg4[%c0_3, %c0_4], %3 {strides = array<i32>} : memref<16x256xf32, #tpu.memory_space<vmem>>, vector<16x256xf32>,
    return
  }
  func.func @transform_0(%arg0: i32, %arg1: i32) -> (i32, i32) {
    %c0_i32 = arith.constant 0 : i32
    return %arg0, %arg1 : i32, i32
  }
  func.func @transform_1(%arg0: i32, %arg1: i32) -> (i32, i32) {
    %c0_i32 = arith.constant 0 : i32
    %c0_i32_0 = arith.constant 0 : i32
    return %arg0, %c0_i32 : i32, i32
  }
  func.func @transform_2(%arg0: i32, %arg1: i32) -> (i32, i32) {
    %c0_i32 = arith.constant 0 : i32
    return %arg0, %arg1 : i32, i32
  }
}

module attributes {stable_mosaic.version = 11 : i64} {
  func.func @_logits_lse_kernel(%arg0: i32, %arg1: i32, %arg2: memref<16x32xf32, #tpu.memory_space<vmem>>, %arg3: memref<256x32xf32, #tpu.memory_space<vmem>>, %arg4: memref<1x256xf32, #tpu.memory_space<vmem>>, %arg5: memref<16x256xf32, #tpu.memory_space<vmem>>, %arg6: memref<16x1xf32, #tpu.memory_space<vmem>>, %arg7: memref<16x1xf32, #tpu.memory_space<vmem>>, %arg8: memref<16x1xf32, #tpu.memory_space<vmem>>) attributes {dimension_semantics = [#tpu.dimension_semantics<parallel>, #tpu.dimension_semantics<arbitrary>], iteration_bounds = array<i64: 1, 2>, scalar_prefetch = 0 : i64, scratch_operands = 2 : i64, tpu.core_type = #tpu.core_type<tc>, window_params = [{transform_indices = @transform_0, window_bounds = array<i64: 16, 32>}, {transform_indices = @transform_1, window_bounds = array<i64: 256, 32>}, {transform_indices = @transform_2, window_bounds = array<i64: 1, 256>}, {transform_indices = @transform_3, window_bounds = array<i64: 16, 256>}, {transform_indices = @transform_4, window_bounds = array<i64: 16, 1>}]} {
    %c0 = arith.constant 0 : index
    %c0_0 = arith.constant 0 : index
    %0 = vector.load %arg2[%c0, %c0_0] : memref<16x32xf32, #tpu.memory_space<vmem>>, vector<16x32xf32>
    %c0_1 = arith.constant 0 : index
    %c0_2 = arith.constant 0 : index
    %1 = vector.load %arg3[%c0_1, %c0_2] : memref<256x32xf32, #tpu.memory_space<vmem>>, vector<256x32xf32>
    %cst = arith.constant dense<0.000000e+00> : vector<16x256xf32>
    %2 = tpu.matmul %0, %1, %cst {dimension_numbers = #tpu.dot_dimension_numbers<[1], [1], [0], [0], [0, 0, 1, 0], [], []>} : vector<16x32xf32>, vector<256x32xf32>, vector<16x256xf32> -> vector<16x256xf32>
    %c0_3 = arith.constant 0 : index
    %c0_4 = arith.constant 0 : index
    %3 = vector.load %arg4[%c0_3, %c0_4] : memref<1x256xf32, #tpu.memory_space<vmem>>, vector<1x256xf32>
    %4 = vector.broadcast %3 : vector<1x256xf32> to vector<16x256xf32>
    %5 = arith.addf %2, %4 : vector<16x256xf32>
    %c0_5 = arith.constant 0 : index
    %c0_6 = arith.constant 0 : index
    %6 = vector.load %arg5[%c0_5, %c0_6] : memref<16x256xf32, #tpu.memory_space<vmem>>, vector<16x256xf32>
    tpu.vector_store %arg5[%c0_5, %c0_6], %5 {strides = array<i32>} : memref<16x256xf32, #tpu.memory_space<vmem>>, vector<16x256xf32>,
    %c0_i32 = arith.constant 0 : i32
    %7 = arith.cmpi eq, %arg1, %c0_i32 : i32
    %8 = arith.extui %7 : i1 to i32
    %c0_i32_7 = arith.constant 0 : i32
    %9 = arith.cmpi ne, %8, %c0_i32_7 : i32
    scf.if %9 {
      %cst_19 = arith.constant -1.000000e+30 : f32
      %29 = vector.broadcast %cst_19 : f32 to vector<16x1xf32>
      %c0_20 = arith.constant 0 : index
      %c0_21 = arith.constant 0 : index
      %30 = vector.load %arg7[%c0_20, %c0_21] : memref<16x1xf32, #tpu.memory_space<vmem>>, vector<16x1xf32>
      tpu.vector_store %arg7[%c0_20, %c0_21], %29 {strides = array<i32>} : memref<16x1xf32, #tpu.memory_space<vmem>>, vector<16x1xf32>,
      %cst_22 = arith.constant 0.000000e+00 : f32
      %31 = vector.broadcast %cst_22 : f32 to vector<16x1xf32>
      %c0_23 = arith.constant 0 : index
      %c0_24 = arith.constant 0 : index
      %32 = vector.load %arg8[%c0_23, %c0_24] : memref<16x1xf32, #tpu.memory_space<vmem>>, vector<16x1xf32>
      tpu.vector_store %arg8[%c0_23, %c0_24], %31 {strides = array<i32>} : memref<16x1xf32, #tpu.memory_space<vmem>>, vector<16x1xf32>,
    } else {
    }
    %c0_8 = arith.constant 0 : index
    %c0_9 = arith.constant 0 : index
    %10 = vector.load %arg7[%c0_8, %c0_9] : memref<16x1xf32, #tpu.memory_space<vmem>>, vector<16x1xf32>
    %cst_10 = arith.constant dense<0xFF800000> : vector<16xf32>
    %11 = vector.multi_reduction <maximumf>, %5, %cst_10 [1] : vector<16x256xf32> to vector<16xf32>
    %12 = vector.shape_cast %11 : vector<16xf32> to vector<16x1xf32>
    %13 = arith.maximumf %10, %12 : vector<16x1xf32>
    %c0_11 = arith.constant 0 : index
    %c0_12 = arith.constant 0 : index
    %14 = vector.load %arg8[%c0_11, %c0_12] : memref<16x1xf32, #tpu.memory_space<vmem>>, vector<16x1xf32>
    %15 = arith.subf %10, %13 : vector<16x1xf32>
    %16 = math.exp %15 : vector<16x1xf32>
    %17 = arith.mulf %14, %16 : vector<16x1xf32>
    %18 = vector.broadcast %13 : vector<16x1xf32> to vector<16x256xf32>
    %19 = arith.subf %5, %18 : vector<16x256xf32>
    %20 = math.exp %19 : vector<16x256xf32>
    %cst_13 = arith.constant dense<0.000000e+00> : vector<16xf32>
    %21 = vector.multi_reduction <add>, %20, %cst_13 [1] : vector<16x256xf32> to vector<16xf32>
    %22 = vector.shape_cast %21 : vector<16xf32> to vector<16x1xf32>
    %23 = arith.addf %17, %22 : vector<16x1xf32>
    %c0_14 = arith.constant 0 : index
    %c0_15 = arith.constant 0 : index
    %24 = vector.load %arg8[%c0_14, %c0_15] : memref<16x1xf32, #tpu.memory_space<vmem>>, vector<16x1xf32>
    tpu.vector_store %arg8[%c0_14, %c0_15], %23 {strides = array<i32>} : memref<16x1xf32, #tpu.memory_space<vmem>>, vector<16x1xf32>,
    %c0_16 = arith.constant 0 : index
    %c0_17 = arith.constant 0 : index
    %25 = vector.load %arg7[%c0_16, %c0_17] : memref<16x1xf32, #tpu.memory_space<vmem>>, vector<16x1xf32>
    tpu.vector_store %arg7[%c0_16, %c0_17], %13 {strides = array<i32>} : memref<16x1xf32, #tpu.memory_space<vmem>>, vector<16x1xf32>,
    %c1_i32 = arith.constant 1 : i32
    %26 = arith.cmpi eq, %arg1, %c1_i32 : i32
    %27 = arith.extui %26 : i1 to i32
    %c0_i32_18 = arith.constant 0 : i32
    %28 = arith.cmpi ne, %27, %c0_i32_18 : i32
    scf.if %28 {
      %c0_19 = arith.constant 0 : index
      %c0_20 = arith.constant 0 : index
      %29 = vector.load %arg7[%c0_19, %c0_20] : memref<16x1xf32, #tpu.memory_space<vmem>>, vector<16x1xf32>
      %c0_21 = arith.constant 0 : index
      %c0_22 = arith.constant 0 : index
      %30 = vector.load %arg8[%c0_21, %c0_22] : memref<16x1xf32, #tpu.memory_space<vmem>>, vector<16x1xf32>
      %31 = math.log %30 : vector<16x1xf32>
      %32 = arith.addf %29, %31 : vector<16x1xf32>
      %c0_23 = arith.constant 0 : index
      %c0_24 = arith.constant 0 : index
      %33 = vector.load %arg6[%c0_23, %c0_24] : memref<16x1xf32, #tpu.memory_space<vmem>>, vector<16x1xf32>
      tpu.vector_store %arg6[%c0_23, %c0_24], %32 {strides = array<i32>} : memref<16x1xf32, #tpu.memory_space<vmem>>, vector<16x1xf32>,
    } else {
    }
    return
  }
  func.func @transform_0(%arg0: i32, %arg1: i32) -> (i32, i32) {
    %c0_i32 = arith.constant 0 : i32
    %c0_i32_0 = arith.constant 0 : i32
    return %arg0, %c0_i32 : i32, i32
  }
  func.func @transform_1(%arg0: i32, %arg1: i32) -> (i32, i32) {
    %c0_i32 = arith.constant 0 : i32
    %c0_i32_0 = arith.constant 0 : i32
    return %arg1, %c0_i32 : i32, i32
  }
  func.func @transform_2(%arg0: i32, %arg1: i32) -> (i32, i32) {
    %c0_i32 = arith.constant 0 : i32
    %c0_i32_0 = arith.constant 0 : i32
    return %c0_i32, %arg1 : i32, i32
  }
  func.func @transform_3(%arg0: i32, %arg1: i32) -> (i32, i32) {
    %c0_i32 = arith.constant 0 : i32
    return %arg0, %arg1 : i32, i32
  }
  func.func @transform_4(%arg0: i32, %arg1: i32) -> (i32, i32) {
    %c0_i32 = arith.constant 0 : i32
    %c0_i32_0 = arith.constant 0 : i32
    return %arg0, %c0_i32 : i32, i32
  }
}

</mosaic_0001>

<bundles_post_ra>
// kernel: _projection_2d.3
= control target key start
LH: loop header
LB: loop body
LE: loop exit
PB: predicated region body
PF: predicated region fallthrough
CT: control target
= control target key end

     0   :  { %7 = vsyncpa [#allocation3], 0  ;;  %s704_s0 = inlined_call_operand.hbm [shape: f32[16,512], index: 0, kind: input, shape index: {}, may-alias: {0,2}]   ;;  %s705_s1 = inlined_call_operand.vmem [shape: f32[16,1], index: 1, kind: input, shape index: {}]   ;;  %s706_s2 = inlined_call_operand.hbm [shape: f32[16,512], index: 2, kind: output, shape index: {}, may-alias: {0,2}]  }
   0x1   :  { %9 = vsyncpa [#allocation3 + $0x1], 0 }
   0x2   :  { %10 = vsyncpa [#allocation4], 0 }
   0x3   :  { %12 = vsyncpa [#allocation4 + $0x1], 0  ;;  %s578_s9 = smov 0   ;;  %s580_s10 = smov 0  }
   0x4   :  { %s582_s11 = smov 0   ;;  %s584_s12 = smov 0  }
   0x5   :  { %s586_s13 = smov 0   ;;  %s588_s14 = smov 0  }
   0x6 LB: > { %s354_s15 = sadd.s32 4294967295, %s554_s14   ;;  %s355_s16 = sadd.s32 4294967294, %s554_s14   ;;  %s554_s14 = sphi %s588_s14, %s18_s14   ;;  %s550_s13 = sphi %s586_s13, %s715_s13   ;;  %s546_s12 = sphi %s584_s12, %s714_s12   ;;  %s542_s11 = sphi %s582_s11, %s713_s11   ;;  %s538_s10 = sphi %s580_s10, %s712_s10   ;;  %s534_s9 = sphi %s578_s9, %s711_s9  }
   0x7   : > { %s27_s17 = sadd.s32 1, %s550_s13  ;;  %s39_s18 = sadd.s32 1, %s542_s11 }
   0x8   : > { %p28_p0 = scmp.ge.s32.totalorder %s27_s17, 2  ;;  %p46_p1 = scmp.ne.s32.totalorder %s542_s11, %s538_s10 }
   0x9   : > { %p47_p2 = scmp.eq.s32.totalorder %s554_s14, 0  ;;  %p52_p3 = scmp.ne.s32.totalorder %s538_s10, %s534_s9 }
   0xa   : > { %s717_s17 = smov (%p28_p0, %s27_s17), 0  ;;  %p53_p5 = scmp.eq.s32.totalorder %s354_s15, 0 }
   0xb   : > { %p619_p4 = por %p47_p2, %p46_p1  ;;  %s35_s20 = ssub.s32 %s550_s13, %s717_s17 }
   0xc   : > { %p104_p6 = scmp.eq.s32.totalorder %s354_s15, 1  ;;  %p37_p7 = scmp.eq.s32.totalorder %s35_s20, 0 }
   0xd   : > { %p625_p8 = por %p53_p5, %p52_p3  ;;  %p110_p10 = scmp.eq.s32.totalorder %s355_s16, 1 }
   0xe   : > { %p629_p9 = por %p104_p6, %p46_p1  ;;  %p358_p12 = scmp.ge.s32.totalorder %s554_s14, 2 }
   0xf   : > { %s634_s23 = scalar_select %p37_p7, %s542_s11, %s39_s18  }
  0x10   : > { %p636_p11 = por %p110_p10, %p52_p3  ;;  %p384_p13 = scmp.lt.s32.totalorder %s554_s14, 2 }
  0x11   : > { %s139_s25 = sand.u32 1, %s542_s11   ;;  %s370_s27 = sshll.u32 %s550_s13, 4 }
  0x12   : > { %s359_s26 = sshll.u32 %s139_s25, 5  ;;  %s151_s30 = scalar_lea.hbm %s704_s0, %s370_s27 }
  0x13   : > { %s143_s3 = scalar_lea.vmem [#allocation2], %s359_s26  ;;  %s152_s5 = sshll.u32 %s151_s30, 4  ;;  %s153_s5 = int_to_ptr.hbm [resolvable:$true] %s152_s5 }
  0x14   : > { %s154_s4 = sshll.u32 %s143_s3, 4  ;;  %p377_p0 = pnand %p384_p13, %p619_p4  ;;  %s155_s4 = int_to_ptr.vmem [resolvable:$true] %s154_s4 }
  0x15   : > { %s140_s6 = scalar_lea.sflag [#allocation3], %s139_s25  ;;  %s556_s7 = smov 512  }
  0x16   : > { %s557_s8 = smov 256   ;;  %s558_s15 = smov 16  }
  0x17   : > { %379 = dma.hbm_to_vmem [thread:$0]  (!%p377_p0), %s153_s5, 512, %s155_s4, %s140_s6, %s556_s7, %s557_s8, %s558_s15  }
  0x18   : > { %p362_p1 = scmp.ge.s32.totalorder %s554_s14, 1  ;;  %p162_p2 = scmp.lt.s32.totalorder %s554_s14, 3 }
  0x1a   : > { %p163_p3 = pnand %p362_p1, %p162_p2 }
  0x1b   : > { %s652_s16 = sand.u32 (!%p163_p3), 1, %s538_s10  }
  0x1c   : > { %166 = sbr.rel (%p163_p3) target bundleno = 167 (0xa7), region = 28  ;;  %s363_s18 = sshll.u32 (!%p163_p3), %s652_s16, 5 }
  0x1d   : > { %s169_s20 = scalar_lea.sflag (!%p163_p3), [#allocation3], %s652_s16  ;;  %s172_s26 = scalar_lea.vmem (!%p163_p3), [#allocation2], %s363_s18 }
  0x21   : > { %525 = dma.done.wait (%p625_p8), %s169_s20, 512  }
  0x22   : > { %527 = vsyncadd (%p625_p8), %s169_s20, 4294966784  ;;  %v559_v0 = vmov 0   ;;  %v213_v1 = vld [vmem:[%s705_s1] sm:$0xff]  ;;  %v214_v2 = vld [vmem:[%s705_s1 + $0x8] sm:$0xff]  ;;  %s371_s29 = sshll.u32 %s546_s12, 4  ;;  %s198_s21 = scalar_lea.vmem [#allocation5], %s363_s18 }
  0x23   : > { %441 = vset.pattern.permute.xlu0 %v559_v0  ;;  %v209_v3 = vld [vmem:[%s172_s26] sm:$0xff]  ;;  %v210_v4 = vld [vmem:[%s172_s26 + $0x8] sm:$0xff]  ;;  %s248_s4 = scalar_lea.hbm %s706_s2, %s371_s29  ;;  %s249_s5 = sshll.u32 %s198_s21, 4  ;;  %v211_v8 = vld [vmem:[%s172_s26 + $0x10] sm:$0xff]  ;;  %s250_s5 = int_to_ptr.vmem [resolvable:$true] %s249_s5 }
  0x24   : > { %217 = vperm.xlu0 %441, %v213_v1   ;;  %v212_v9 = vld [vmem:[%s172_s26 + $0x18] sm:$0xff]  ;;  %s251_s6 = sshll.u32 %s248_s4, 4  ;;  %s234_s12 = scalar_lea.sflag [#allocation4], %s652_s16  ;;  %s252_s6 = int_to_ptr.hbm [resolvable:$true] %s251_s6 }
  0x25   : > { %s486_s7 = sshra.s32 %s252_s6, 4  ;;  %s492_s20 = scalar_lea.hbm %s706_s2, 64  ;;  %s487_s7 = int_to_ptr.hbm [resolvable:$true] %s486_s7 }
  0x26   : > { %s488_s8 = scalar_lea.hbm %s487_s7, 32  ;;  %p493_p7 = scmp.lt.s32.totalorder %s487_s7, %s706_s2 }
  0x27   : > { %p489_p4 = scmp.ne.s32.totalorder %s487_s7, %s488_s8  ;;  %p494_p8 = scmp.lt.s32.totalorder %s492_s20, %s488_s8 }
  0x29   : > { %p490_p5 = pnand %p489_p4, %p629_p9  ;;  %p495_p10 = por %p494_p8, %p493_p7 }
  0x2b   : > { %p491_p6 = pneg %p490_p5 }
  0x2c   : > { %222 = vperm.xlu0 %441, %v214_v2  }
  0x2d   : > { %p496_p13 = pnand %p495_p10, %p491_p6 }
  0x96   : > { %v218_v5 = vpop.permute.xlu0 %217 }
  0x97   : > { %v225_v6 = vsub.f32 %v209_v3, %v218_v5  ;;  %v226_v7 = vsub.f32 %v210_v4, %v218_v5 }
  0x99   : > { %229 = vst [vmem:[%s198_s21] sm:$0xff] %v225_v6 }
  0x9a   : > { %230 = vst [vmem:[%s198_s21 + $0x8] sm:$0xff] %v226_v7 }
  0x9e   : > { %v223_v10 = vpop.permute.xlu0 %222 }
  0x9f   : > { %v227_v11 = vsub.f32 %v211_v8, %v223_v10  ;;  %v228_v12 = vsub.f32 %v212_v9, %v223_v10 }
  0xa1   : > { %231 = vst [vmem:[%s198_s21 + $0x10] sm:$0xff] %v227_v11 }
  0xa2   : > { %232 = vst [vmem:[%s198_s21 + $0x18] sm:$0xff] %v228_v12 }
  0xa3   : > { %499 = shalt.err (!%p496_p13)
}
  0xa4   : > { %s560_s16 = smov 256   ;;  %s561_s25 = smov 512  }
  0xa5   : > { %s562_s27 = smov 16  }
  0xa6   : > { %374 = dma.vmem_to_hbm [thread:$0]  (%p629_p9), %s250_s5, 512, %s252_s6, %s234_s12, %s560_s16, %s561_s25, %s562_s27  }
  0xa7 PF: > { %s266_s28 = sand.u32 1, %s534_s9   ;;  %p381_p0 = pnand %p358_p12, %p636_p11 }
  0xa8   : > { %s267_s29 = scalar_lea.sflag [#allocation4], %s266_s28 }
  0xa9   : > { %p382_p1 = pneg %p381_p0 }
  0xab   : > { %529 = dma.done.wait (%p382_p1), %s267_s29, 512  }
  0xac   : > { %531 = vsyncadd (%p382_p1), %s267_s29, 4294966784  ;;  %s18_s14 = sadd.s32 1, %s554_s14   ;;  %s711_s9 = smov %s538_s10 }
  0xad   : > { %p15_p2 = scmp.ge.s32.totalorder %s18_s14, 4   ;;  %s712_s10 = smov %s542_s11 }
  0xae   : > { %s713_s11 = smov %s634_s23  ;;  %s714_s12 = smov %s550_s13 }
  0xaf   : > { %s715_s13 = smov %s717_s17  ;;  %17 = sbr.rel (!%p15_p2) target bundleno = 6 (0x6), region = 76 }
  0xb4   :  { %273 = vsyncpa [#allocation3], 1 }
  0xb5   :  { %275 = vsyncpa [#allocation3 + $0x1], 1 }
  0xb6   :  { %276 = vsyncpa [#allocation4], 1 }
  0xb7   :  { %278 = vsyncpa [#allocation4 + $0x1], 1 }

// kernel: _projection_2d.2
= control target key start
LH: loop header
LB: loop body
LE: loop exit
PB: predicated region body
PF: predicated region fallthrough
CT: control target
= control target key end

     0   :  { %10 = vsyncpa [#allocation5], 0  ;;  %s1200_s0 = inlined_call_operand.vmem [shape: f32[16,32], index: 0, kind: input, shape index: {}]   ;;  %s1201_s1 = inlined_call_operand.vmem [shape: f32[512,32], index: 1, kind: input, shape index: {}]   ;;  %s1202_s2 = inlined_call_operand.vmem [shape: f32[1,512], index: 2, kind: input, shape index: {}]   ;;  %s1203_s3 = inlined_call_operand.hbm [shape: f32[16,512], index: 3, kind: output, shape index: {0}]   ;;  %s1204_s4 = inlined_call_operand.vmem [shape: f32[16,1], index: 4, kind: output, shape index: {1}]  }
   0x1   :  { %12 = vsyncpa [#allocation5 + $0x1], 0  ;;  %s967_s15 = smov 0   ;;  %s969_s16 = smov 0  }
   0x2   :  { %s971_s17 = smov 0   ;;  %s973_s18 = smov 0  }
   0x3   :  { %s975_s19 = smov 0   ;;  %s977_s20 = smov 0  }
   0x4 LB: > { %s689_s21 = sadd.s32 4294967295, %s934_s20   ;;  %s690_s22 = sadd.s32 4294967294, %s934_s20   ;;  %s934_s20 = sphi %s977_s20, %s18_s20   ;;  %s930_s19 = sphi %s975_s19, %s1211_s19   ;;  %s926_s18 = sphi %s973_s18, %s1210_s18   ;;  %s922_s17 = sphi %s971_s17, %s1209_s17   ;;  %s918_s16 = sphi %s969_s16, %s1208_s16   ;;  %s914_s15 = sphi %s967_s15, %s1207_s15  }
   0x5   : > { %s27_s23 = sadd.s32 1, %s930_s19  ;;  %s117_s24 = sadd.s32 1, %s922_s17 }
   0x6   : > { %p28_p0 = scmp.ge.s32.totalorder %s27_s23, 2  ;;  %p127_p1 = scmp.ne.s32.totalorder %s922_s17, %s918_s16 }
   0x7   : > { %p128_p2 = scmp.eq.s32.totalorder %s689_s21, 1  ;;  %p133_p3 = scmp.ne.s32.totalorder %s918_s16, %s914_s15 }
   0x8   : > { %s1213_s23 = smov (%p28_p0, %s27_s23), 0  ;;  %p134_p5 = scmp.eq.s32.totalorder %s690_s22, 1 }
   0x9   : > { %p1007_p4 = por %p128_p2, %p127_p1  ;;  %s113_s26 = ssub.s32 %s930_s19, %s1213_s23 }
   0xa   : > { %p694_p6 = scmp.ge.s32.totalorder %s934_s20, 1  ;;  %p115_p7 = scmp.eq.s32.totalorder %s113_s26, 0 }
   0xb   : > { %p1014_p8 = por %p134_p5, %p133_p3  ;;  %p204_p9 = scmp.lt.s32.totalorder %s934_s20, 3 }
   0xc   : > { %s1020_s28 = scalar_select %p115_p7, %s922_s17, %s117_s24  }
   0xd   : > { %p205_p10 = pnand %p694_p6, %p204_p9 }
   0xe   : > { %s696_s29 = sshll.u32 (!%p205_p10), %s926_s18, 5  ;;  %s698_s12 = sshll.u32 (!%p205_p10), %s926_s18, 1 }
   0xf   : > { %208 = sbr.rel (%p205_p10) target bundleno = 640 (0x280), region = 32  ;;  %p251_p11 = scmp.lt.s32.totalorder (!%p205_p10), %s696_s29, 63 }
  0x10   : > { %p257_p12 = scmp.lt.s32.totalorder (!%p205_p10), %s698_s12, 3  ;;  %s234_s22 = sand.u32 (!%p205_p10), 1, %s918_s16  }
  0x11   : > { %s695_s24 = sshll.u32 (!%p205_p10), %s234_s22, 5  ;;  %p735_p13 = scmp.ne.s32.totalorder (!%p205_p10), %s926_s18, 0 }
  0x12   : > { %s1141_s26 = scalar_lea.vmem (!%p205_p10), [#allocation4], %s695_s24 }
  0x14   : > { %s1215_s29 = smov (!%p251_p11, %s696_s29), 63  ;;  %vm309_vm0 = vcmask 261120   ;;  %v270_v32 = vld [vmem:[%s1200_s0 + $0x8] sm:$0xff]  ;;  %v269_v33 = vld [vmem:[%s1200_s0] sm:$0xff]  ;;  %s1217_s12 = smov (!%p257_p12, %s698_s12), 3 }
  0x15   : > { %s697_s30 = sshll.u32 %s1215_s29, 3  ;;  %s259_s21 = scalar_lea.vmem %s1202_s2, %s1217_s12 }
  0x16   : > { %s1026_s7 = scalar_lea.vmem %s1201_s1, %s697_s30  ;;  %v303_v34 = vld [vmem:[%s259_s21] sm:$0x3] }
  0x17   : > { %v286_v0 = vld [vmem:[%s1026_s7 + $0x78] sm:$0xff]  ;;  %v285_v2 = vld [vmem:[%s1026_s7 + $0x70] sm:$0xff]  ;;  %v284_v4 = vld [vmem:[%s1026_s7 + $0x68] sm:$0xff]  ;;  %v305_v35 = vperm.slane %v303_v34, 0  ;;  %v306_v36 = vperm.slane %v303_v34, 1 }
  0x18   : > { %v302_v1 = vld [vmem:[%s1026_s7 + $0xf8] sm:$0xff]  ;;  %745 = vmatpush.xpose.msk.msra.mxu2 %vm309_vm0, %v286_v0  ;;  %v301_v3 = vld [vmem:[%s1026_s7 + $0xf0] sm:$0xff]  ;;  %699 = vmatpush.xpose.msk.msra.mxu0 %vm309_vm0, %v286_v0  ;;  %v300_v5 = vld [vmem:[%s1026_s7 + $0xe8] sm:$0xff] }
  0x19   : > { %761 = vmatpush.xpose.msk.msra.mxu3 %vm309_vm0, %v302_v1  ;;  %717 = vmatpush.xpose.msk.msra.mxu1 %vm309_vm0, %v302_v1  ;;  %v283_v6 = vld [vmem:[%s1026_s7 + $0x60] sm:$0xff]  ;;  %v282_v8 = vld [vmem:[%s1026_s7 + $0x58] sm:$0xff]  ;;  %v281_v10 = vld [vmem:[%s1026_s7 + $0x50] sm:$0xff] }
  0x1a   : > { %v299_v7 = vld [vmem:[%s1026_s7 + $0xe0] sm:$0xff]  ;;  %v298_v9 = vld [vmem:[%s1026_s7 + $0xd8] sm:$0xff]  ;;  %v297_v11 = vld [vmem:[%s1026_s7 + $0xd0] sm:$0xff] }
  0x1b   : > { %v280_v12 = vld [vmem:[%s1026_s7 + $0x48] sm:$0xff]  ;;  %v279_v14 = vld [vmem:[%s1026_s7 + $0x40] sm:$0xff]  ;;  %v278_v16 = vld [vmem:[%s1026_s7 + $0x38] sm:$0xff] }
  0x1c   : > { %746 = vmatpush.xpose.msk.msra.mxu2 %vm309_vm0, %v285_v2  ;;  %700 = vmatpush.xpose.msk.msra.mxu0 %vm309_vm0, %v285_v2  ;;  %v296_v13 = vld [vmem:[%s1026_s7 + $0xc8] sm:$0xff]  ;;  %v295_v15 = vld [vmem:[%s1026_s7 + $0xc0] sm:$0xff]  ;;  %v294_v17 = vld [vmem:[%s1026_s7 + $0xb8] sm:$0xff] }
  0x1d   : > { %762 = vmatpush.xpose.msk.msra.mxu3 %vm309_vm0, %v301_v3  ;;  %718 = vmatpush.xpose.msk.msra.mxu1 %vm309_vm0, %v301_v3  ;;  %v277_v18 = vld [vmem:[%s1026_s7 + $0x30] sm:$0xff]  ;;  %v276_v20 = vld [vmem:[%s1026_s7 + $0x28] sm:$0xff]  ;;  %v275_v22 = vld [vmem:[%s1026_s7 + $0x20] sm:$0xff] }
  0x1e   : > { %v293_v19 = vld [vmem:[%s1026_s7 + $0xb0] sm:$0xff]  ;;  %v292_v21 = vld [vmem:[%s1026_s7 + $0xa8] sm:$0xff]  ;;  %v291_v23 = vld [vmem:[%s1026_s7 + $0xa0] sm:$0xff] }
  0x1f   : > { %v274_v24 = vld [vmem:[%s1026_s7 + $0x18] sm:$0xff]  ;;  %v273_v26 = vld [vmem:[%s1026_s7 + $0x10] sm:$0xff]  ;;  %v272_v28 = vld [vmem:[%s1026_s7 + $0x8] sm:$0xff] }
  0x20   : > { %747 = vmatpush.xpose.msk.msra.mxu2 %vm309_vm0, %v284_v4  ;;  %701 = vmatpush.xpose.msk.msra.mxu0 %vm309_vm0, %v284_v4  ;;  %v290_v25 = vld [vmem:[%s1026_s7 + $0x98] sm:$0xff]  ;;  %v289_v27 = vld [vmem:[%s1026_s7 + $0x90] sm:$0xff]  ;;  %v288_v29 = vld [vmem:[%s1026_s7 + $0x88] sm:$0xff] }
  0x21   : > { %763 = vmatpush.xpose.msk.msra.mxu3 %vm309_vm0, %v300_v5  ;;  %719 = vmatpush.xpose.msk.msra.mxu1 %vm309_vm0, %v300_v5  ;;  %v271_v30 = vld [vmem:[%s1026_s7] sm:$0xff] }
  0x22   : > { %v287_v31 = vld [vmem:[%s1026_s7 + $0x80] sm:$0xff] }
  0x24   : > { %748 = vmatpush.xpose.msk.msra.mxu2 %vm309_vm0, %v283_v6  ;;  %702 = vmatpush.xpose.msk.msra.mxu0 %vm309_vm0, %v283_v6 }
  0x25   : > { %764 = vmatpush.xpose.msk.msra.mxu3 %vm309_vm0, %v299_v7  ;;  %720 = vmatpush.xpose.msk.msra.mxu1 %vm309_vm0, %v299_v7 }
  0x28   : > { %749 = vmatpush.xpose.msk.msra.mxu2 %vm309_vm0, %v282_v8  ;;  %703 = vmatpush.xpose.msk.msra.mxu0 %vm309_vm0, %v282_v8 }
  0x29   : > { %765 = vmatpush.xpose.msk.msra.mxu3 %vm309_vm0, %v298_v9  ;;  %721 = vmatpush.xpose.msk.msra.mxu1 %vm309_vm0, %v298_v9 }
  0x2c   : > { %750 = vmatpush.xpose.msk.msra.mxu2 %vm309_vm0, %v281_v10  ;;  %704 = vmatpush.xpose.msk.msra.mxu0 %vm309_vm0, %v281_v10 }
  0x2d   : > { %766 = vmatpush.xpose.msk.msra.mxu3 %vm309_vm0, %v297_v11  ;;  %722 = vmatpush.xpose.msk.msra.mxu1 %vm309_vm0, %v297_v11 }
  0x30   : > { %751 = vmatpush.xpose.msk.msra.mxu2 %vm309_vm0, %v280_v12  ;;  %705 = vmatpush.xpose.msk.msra.mxu0 %vm309_vm0, %v280_v12 }
  0x31   : > { %767 = vmatpush.xpose.msk.msra.mxu3 %vm309_vm0, %v296_v13  ;;  %723 = vmatpush.xpose.msk.msra.mxu1 %vm309_vm0, %v296_v13 }
  0x34   : > { %752 = vmatpush.xpose.msk.msra.mxu2 %vm309_vm0, %v279_v14  ;;  %706 = vmatpush.xpose.msk.msra.mxu0 %vm309_vm0, %v279_v14 }
  0x35   : > { %768 = vmatpush.xpose.msk.msra.mxu3 %vm309_vm0, %v295_v15  ;;  %724 = vmatpush.xpose.msk.msra.mxu1 %vm309_vm0, %v295_v15 }
  0x38   : > { %753 = vmatpush.xpose.msk.msra.mxu2 %vm309_vm0, %v278_v16  ;;  %707 = vmatpush.xpose.msk.msra.mxu0 %vm309_vm0, %v278_v16 }
  0x39   : > { %769 = vmatpush.xpose.msk.msra.mxu3 %vm309_vm0, %v294_v17  ;;  %725 = vmatpush.xpose.msk.msra.mxu1 %vm309_vm0, %v294_v17 }
  0x3c   : > { %754 = vmatpush.xpose.msk.msra.mxu2 %vm309_vm0, %v277_v18  ;;  %708 = vmatpush.xpose.msk.msra.mxu0 %vm309_vm0, %v277_v18 }
  0x3d   : > { %770 = vmatpush.xpose.msk.msra.mxu3 %vm309_vm0, %v293_v19  ;;  %726 = vmatpush.xpose.msk.msra.mxu1 %vm309_vm0, %v293_v19 }
  0x40   : > { %755 = vmatpush.xpose.msk.msra.mxu2 %vm309_vm0, %v276_v20  ;;  %709 = vmatpush.xpose.msk.msra.mxu0 %vm309_vm0, %v276_v20 }
  0x41   : > { %771 = vmatpush.xpose.msk.msra.mxu3 %vm309_vm0, %v292_v21  ;;  %727 = vmatpush.xpose.msk.msra.mxu1 %vm309_vm0, %v292_v21 }
  0x44   : > { %756 = vmatpush.xpose.msk.msra.mxu2 %vm309_vm0, %v275_v22  ;;  %710 = vmatpush.xpose.msk.msra.mxu0 %vm309_vm0, %v275_v22 }
  0x45   : > { %772 = vmatpush.xpose.msk.msra.mxu3 %vm309_vm0, %v291_v23  ;;  %728 = vmatpush.xpose.msk.msra.mxu1 %vm309_vm0, %v291_v23 }
  0x48   : > { %757 = vmatpush.xpose.msk.msra.mxu2 %vm309_vm0, %v274_v24  ;;  %711 = vmatpush.xpose.msk.msra.mxu0 %vm309_vm0, %v274_v24 }
  0x49   : > { %773 = vmatpush.xpose.msk.msra.mxu3 %vm309_vm0, %v290_v25  ;;  %729 = vmatpush.xpose.msk.msra.mxu1 %vm309_vm0, %v290_v25 }
  0x4c   : > { %758 = vmatpush.xpose.msk.msra.mxu2 %vm309_vm0, %v273_v26  ;;  %712 = vmatpush.xpose.msk.msra.mxu0 %vm309_vm0, %v273_v26 }
  0x4d   : > { %774 = vmatpush.xpose.msk.msra.mxu3 %vm309_vm0, %v289_v27  ;;  %730 = vmatpush.xpose.msk.msra.mxu1 %vm309_vm0, %v289_v27 }
  0x50   : > { %759 = vmatpush.xpose.msk.msra.mxu2 %vm309_vm0, %v272_v28  ;;  %713 = vmatpush.xpose.msk.msra.mxu0 %vm309_vm0, %v272_v28 }
  0x51   : > { %775 = vmatpush.xpose.msk.msra.mxu3 %vm309_vm0, %v288_v29  ;;  %731 = vmatpush.xpose.msk.msra.mxu1 %vm309_vm0, %v288_v29 }
  0x54   : > { %760 = vmatpush.xpose.msk.msra.mxu2 %vm309_vm0, %v271_v30  ;;  %714 = vmatpush.xpose.msk.msra.mxu0 %vm309_vm0, %v271_v30 }
  0x55   : > { %776 = vmatpush.xpose.msk.msra.mxu3 %vm309_vm0, %v287_v31  ;;  %732 = vmatpush.xpose.msk.msra.mxu1 %vm309_vm0, %v287_v31 }
  0x57   : > { %716 = vmatmul.msk.f32.vlgmr.msra.gmra.mxu2 %vm309_vm0, %v270_v32  ;;  %715 = vmatmul.msk.f32.vlgmr.msra.gmra.mxu0 %vm309_vm0, %v269_v33 }
  0x58   : > { %734 = vmatmul.msk.f32.vlgmr.msra.gmra.mxu3 %vm309_vm0, %v270_v32  ;;  %733 = vmatmul.msk.f32.vlgmr.msra.gmra.mxu1 %vm309_vm0, %v269_v33 }
  0xd4   : > { %v429_v37 = vpop.f32.mrf.mxu0 }
  0xd5   : > { %v452_v38 = vpop.f32.mrf.mxu1  ;;  %v430_v39 = vadd.f32 %v429_v37, %v305_v35 }
  0xd6   : > { %v453_v40 = vadd.f32 %v452_v38, %v306_v36 }
  0xd7   : > { %458 = vst [vmem:[%s1141_s26] sm:$0xff] %v430_v39 }
  0xd8   : > { %459 = vst [vmem:[%s1141_s26 + $0x8] sm:$0xff] %v453_v40 }
  0xda   : > { %v432_v41 = vpop.f32.mrf.mxu2  ;;  %465 = sbr.rel (%p735_p13) target bundleno = 228 (0xe4), region = 36 }
  0xdb   : > { %v455_v42 = vpop.f32.mrf.mxu3  ;;  %v433_v43 = vadd.f32 %v432_v41, %v305_v35 }
  0xdc   : > { %v456_v44 = vadd.f32 %v455_v42, %v306_v36 }
  0xdd   : > { %460 = vst [vmem:[%s1141_s26 + $0x10] sm:$0xff] %v433_v43 }
  0xde   : > { %461 = vst [vmem:[%s1141_s26 + $0x18] sm:$0xff] %v456_v44 }
  0xdf   : > { %vm466_vm1 = vcmask 7168   ;;  %v936_v45 = vmov -1e+30   ;;  %v937_v46 = vmov 0.0  }
  0xe0   : > { %467 = vst.msk [vmem:[#allocation2] sm:$0xff] %vm466_vm1, %v936_v45 }
  0xe1   : > { %468 = vst.msk [vmem:[#allocation2 + $0x8] sm:$0xff] %vm466_vm1, %v936_v45 }
  0xe2   : > { %469 = vst.msk [vmem:[#allocation3] sm:$0xff] %vm466_vm1, %v937_v46 }
  0xe3   : > { %470 = vst.msk [vmem:[#allocation3 + $0x8] sm:$0xff] %vm466_vm1, %v937_v46 }
  0xe4 PF: > { %v473_v47 = vmax.f32 %v430_v39, %v453_v40  ;;  %v476_v48 = vmax.f32 %v433_v43, %v456_v44  ;;  %v938_v49 = vmov 0   ;;  %vm521_vm2 = vcmask 7168   ;;  %p736_p0 = scmp.ne.s32.totalorder %s926_s18, 1 }
  0xe5   : > { %838 = vset.pattern.permute.xlu1 %v938_v49  ;;  %839 = vset.pattern.permute.xlu0 %v938_v49 }
  0xe6   : > { %474 = vmax.xlane.f32.xlu0 %v473_v47 }
  0xe7   : > { %v471_v50 = vld [vmem:[#allocation2] sm:$0xff] }
  0xe8   : > { %v472_v54 = vld [vmem:[#allocation2 + $0x8] sm:$0xff] }
  0xe9   : > { %v481_v13 = vld [vmem:[#allocation3] sm:$0xff] }
  0xea   : > { %v482_v18 = vld [vmem:[#allocation3 + $0x8] sm:$0xff] }
  0xee   : > { %477 = vmax.xlane.f32.xlu0 %v476_v48 }
 0x159   : > { %v475_v51 = vpop.xlane.xlu0 %474 }
 0x15a   : > { %v479_v52 = vmax.f32 %v471_v50, %v475_v51 }
 0x15c   : > { %v483_v53 = vsub.f32 %v471_v50, %v479_v52  ;;  %524 = vst.msk [vmem:[#allocation2] sm:$0xff] %vm521_vm2, %v479_v52  ;;  %493 = vperm.xlu1 %838, %v479_v52  }
 0x15e   : > { %v485_v10 = vmul.f32 1.442695, %v483_v53 }
 0x161   : > { %v478_v55 = vpop.xlane.xlu0 %477 }
 0x162   : > { %v480_v56 = vmax.f32 %v472_v54, %v478_v55 }
 0x164   : > { %v484_v57 = vsub.f32 %v472_v54, %v480_v56  ;;  %525 = vst.msk [vmem:[#allocation2 + $0x8] sm:$0xff] %vm521_vm2, %v480_v56  ;;  %498 = vperm.xlu1 %838, %v480_v56  }
 0x166   : > { %v487_v11 = vmul.f32 1.442695, %v484_v57 }
 0x1ce   : > { %v494_v58 = vpop.permute.xlu1 %493 }
 0x1cf   : > { %v501_v59 = vsub.f32 %v430_v39, %v494_v58  ;;  %v502_v60 = vsub.f32 %v453_v40, %v494_v58 }
 0x1d1   : > { %v505_v61 = vmul.f32 1.442695, %v501_v59  ;;  %v507_v62 = vmul.f32 1.442695, %v502_v60 }
 0x1d3   : > { %840 = vpow2.f32 %v505_v61 }
 0x1d4   : > { %842 = vpow2.f32 %v507_v62 }
 0x1d6   : > { %v499_v63 = vpop.permute.xlu1 %498 }
 0x1d7   : > { %v503_v0 = vsub.f32 %v433_v43, %v499_v63  ;;  %v504_v1 = vsub.f32 %v456_v44, %v499_v63 }
 0x1d9   : > { %v841_v2 = vpop.eup %840  ;;  %v509_v3 = vmul.f32 1.442695, %v503_v0  ;;  %v511_v4 = vmul.f32 1.442695, %v504_v1 }
 0x1da   : > { %v843_v5 = vpop.eup %842 }
 0x1db   : > { %844 = vpow2.f32 %v509_v3  ;;  %v513_v6 = vadd.f32 %v843_v5, %v841_v2 }
 0x1dc   : > { %846 = vpow2.f32 %v511_v4 }
 0x1dd   : > { %514 = vadd.xlane.f32.xlu2 %v513_v6  ;;  %848 = vpow2.f32 %v485_v10 }
 0x1de   : > { %850 = vpow2.f32 %v487_v11 }
 0x1e1   : > { %v845_v7 = vpop.eup %844 }
 0x1e2   : > { %v847_v8 = vpop.eup %846 }
 0x1e3   : > { %v516_v9 = vadd.f32 %v847_v8, %v845_v7  ;;  %v849_v12 = vpop.eup %848 }
 0x1e4   : > { %v489_v14 = vmul.f32 %v849_v12, %v481_v13  ;;  %v851_v17 = vpop.eup %850 }
 0x1e5   : > { %517 = vadd.xlane.f32.xlu2 %v516_v9  ;;  %v490_v19 = vmul.f32 %v851_v17, %v482_v18 }
 0x250   : > { %v515_v15 = vpop.xlane.xlu2 %514 }
 0x251   : > { %v519_v16 = vadd.f32 %v515_v15, %v489_v14 }
 0x253   : > { %522 = vst.msk [vmem:[#allocation3] sm:$0xff] %vm521_vm2, %v519_v16 }
 0x257   : > { %529 = sbr.rel (%p736_p0) target bundleno = 623 (0x26f), region = 40 }
 0x258   : > { %v518_v20 = vpop.xlane.xlu2 %517 }
 0x259   : > { %v520_v21 = vadd.f32 %v518_v20, %v490_v19 }
 0x25b   : > { %523 = vst.msk [vmem:[#allocation3 + $0x8] sm:$0xff] %vm521_vm2, %v520_v21 }
 0x25c   : > { %v532_v22 = vld [vmem:[#allocation3] sm:$0xff]  ;;  %v530_v25 = vld [vmem:[#allocation2] sm:$0xff]  ;;  %v531_v28 = vld [vmem:[#allocation2 + $0x8] sm:$0xff] }
 0x25d   : > { %852 = vlog2.f32 %v532_v22 }
 0x262   : > { %v533_v23 = vld [vmem:[#allocation3 + $0x8] sm:$0xff] }
 0x263   : > { %854 = vlog2.f32 %v533_v23  ;;  %v853_v24 = vpop.eup %852 }
 0x264   : > { %v535_v27 = vmul.f32 0.6931472, %v853_v24 }
 0x266   : > { %v538_v30 = vadd.f32 %v535_v27, %v530_v25 }
 0x268   : > { %540 = vst.msk [vmem:[%s1204_s4] sm:$0xff] %vm521_vm2, %v538_v30 }
 0x269   : > { %v855_v26 = vpop.eup %854 }
 0x26a   : > { %v537_v29 = vmul.f32 0.6931472, %v855_v26 }
 0x26c   : > { %v539_v31 = vadd.f32 %v537_v29, %v531_v28 }
 0x26e   : > { %541 = vst.msk [vmem:[%s1204_s4 + $0x8] sm:$0xff] %vm521_vm2, %v539_v31 }
 0x26f PF: > { %s744_s7 = sshll.u32 %s926_s18, 4  ;;  %s563_s11 = sshll.u32 %s1141_s26, 4  ;;  %s564_s11 = int_to_ptr.vmem [resolvable:$true] %s563_s11 }
 0x270   : > { %s562_s10 = scalar_lea.hbm %s1203_s3, %s744_s7  ;;  %s543_s13 = scalar_lea.sflag [#allocation5], %s234_s22 }
 0x271   : > { %s565_s12 = sshll.u32 %s562_s10, 4  ;;  %s876_s18 = scalar_lea.hbm %s1203_s3, 64  ;;  %s566_s12 = int_to_ptr.hbm [resolvable:$true] %s565_s12 }
 0x272   : > { %s870_s14 = sshra.s32 %s566_s12, 4  ;;  %s871_s14 = int_to_ptr.hbm [resolvable:$true] %s870_s14 }
 0x273   : > { %s872_s21 = scalar_lea.hbm %s871_s14, 32  ;;  %p877_p5 = scmp.lt.s32.totalorder %s871_s14, %s1203_s3 }
 0x274   : > { %p873_p1 = scmp.ne.s32.totalorder %s871_s14, %s872_s21  ;;  %p878_p6 = scmp.lt.s32.totalorder %s876_s18, %s872_s21 }
 0x276   : > { %p874_p2 = pnand %p873_p1, %p1007_p4  ;;  %p879_p7 = por %p878_p6, %p877_p5 }
 0x278   : > { %p875_p3 = pneg %p874_p2 }
 0x27a   : > { %p880_p9 = pnand %p879_p7, %p875_p3 }
 0x27c   : > { %883 = shalt.err (!%p880_p9)
}
 0x27d   : > { %s939_s22 = smov 256   ;;  %s940_s26 = smov 512  }
 0x27e   : > { %s941_s6 = smov 16  }
 0x27f   : > { %777 = dma.vmem_to_hbm [thread:$0]  (%p1007_p4), %s564_s11, 512, %s566_s12, %s543_s13, %s939_s22, %s940_s26, %s941_s6  }
 0x280 PF: > { %p783_p10 = scmp.ge.s32.totalorder %s934_s20, 2  ;;  %s592_s7 = sand.u32 1, %s914_s15  }
 0x281   : > { %s593_s8 = scalar_lea.sflag [#allocation5], %s592_s7 }
 0x282   : > { %p780_p11 = pnand %p783_p10, %p1014_p8 }
 0x284   : > { %p781_p12 = pneg %p780_p11 }
 0x286   : > { %909 = dma.done.wait (%p781_p12), %s593_s8, 512  }
 0x287   : > { %911 = vsyncadd (%p781_p12), %s593_s8, 4294966784  ;;  %s18_s20 = sadd.s32 1, %s934_s20   ;;  %s1207_s15 = smov %s918_s16 }
 0x288   : > { %p15_p13 = scmp.ge.s32.totalorder %s18_s20, 4   ;;  %s1208_s16 = smov %s922_s17 }
 0x289   : > { %s1209_s17 = smov %s1020_s28  ;;  %s1210_s18 = smov %s930_s19 }
 0x28a   : > { %s1211_s19 = smov %s1213_s23  ;;  %17 = sbr.rel (!%p15_p13) target bundleno = 4 (0x4), region = 93 }
 0x28f   :  { %599 = vsyncpa [#allocation5], 1 }
 0x290   :  { %601 = vsyncpa [#allocation5 + $0x1], 1 }

</bundles_post_ra>
